<compile_context>
chip_gen: v6e
topology: v6e:2x2x1
jax: 0.10.0
libtpu: 0.0.40
codegen_flags: <defaults>
</compile_context>

<pallas_src>
import functools

import jax
import jax.numpy as jnp
from jax.experimental import pallas as pl
from jax.experimental.pallas import tpu as pltpu


# ---------------------------------------------------------------------------
# Kernel
# ---------------------------------------------------------------------------
def _wbce_kernel(pred_ref, gt_ref, neg_ref, pbce_ref, nbce_ref,
                 *, fold_w, assume_binary_gt):
    """Grid point (i, j): rows-tile i, hw-tile j.

    Outputs (accumulated across j, index_map constant in j):
      neg_ref  : per-row lane-wide partial sum of [gt == 0]
      pbce_ref : per-row lane-wide partial sum of [gt == 1] * bce
      nbce_ref : per-row lane-wide partial sum of [gt == 0] * bce
    """
    j = pl.program_id(1)

    @pl.when(j == 0)
    def _():
        neg_ref[...] = jnp.zeros_like(neg_ref)
        pbce_ref[...] = jnp.zeros_like(pbce_ref)
        nbce_ref[...] = jnp.zeros_like(nbce_ref)

    x = pred_ref[...].astype(jnp.float32)     # (tr, thw) logits
    g = gt_ref[...].astype(jnp.float32)       # (tr, thw) targets

    # Numerically stable BCE with logits: max(x,0) - x*y + log1p(exp(-|x|)).
    bce = jnp.maximum(x, 0.0) - x * g + jnp.log1p(jnp.exp(-jnp.abs(x)))

    thw = x.shape[-1]
    nck = thw // fold_w

    def fold(v):
        # Lane-wise fold (tr, thw) -> (tr, fold_w) via aligned static slices:
        # pure VPU adds, no reshape/relayout, no per-tile XLU reduce.
        acc = v[:, 0:fold_w]
        for k in range(1, nck):
            acc = acc + v[:, k * fold_w:(k + 1) * fold_w]
        return acc

    if assume_binary_gt:
        # gt guaranteed in {0,1}: compares/selects -> arithmetic identities.
        pos_bce = g * bce
        pbce_ref[...] += fold(pos_bce)
        nbce_ref[...] += fold(bce - pos_bce)
        neg_ref[...] += jnp.float32(nck) - fold(g)
    else:
        # Exact reference semantics: any gt not in {0,1} gets zero weight.
        pos_f = (g == 1.0).astype(jnp.float32)
        neg_f = (g == 0.0).astype(jnp.float32)
        neg_ref[...] += fold(neg_f)
        pbce_ref[...] += fold(pos_f * bce)
        nbce_ref[...] += fold(neg_f * bce)


# ---------------------------------------------------------------------------
# Tiling / device heuristics
# ---------------------------------------------------------------------------
def _best_divisor(n, cap, mult):
    """Largest d <= min(n, cap) with n % d == 0 and (d % mult == 0 or d == n).
    Falls back to n (full extent -- always layout-legal)."""
    cap = min(n, cap)
    for d in range(cap, 0, -1):
        if n % d == 0 and (d % mult == 0 or d == n):
            return d
    return n


def _choose_tiles(rows, hw_p, elem_bytes, target_block_bytes, min_row_steps):
    """Pick (tr, thw): tr | rows (mult of 8 or full extent), thw | hw_p (mult
    of 128), block ~<= target_block_bytes, and rows/tr >= min_row_steps when
    feasible (so the 'parallel' row axis can shard across TensorCores)."""
    max_elems = max(target_block_bytes // max(elem_bytes, 1), 8 * 128)
    row_cap = rows
    if min_row_steps > 1 and rows >= 8 * min_row_steps:
        row_cap = rows // min_row_steps
    row_cap = min(row_cap, max(max_elems // 128, 8))
    tr = _best_divisor(rows, row_cap, 8)
    thw_cap = max(max_elems // tr, 128)
    thw = _best_divisor(hw_p, thw_cap, 128)
    return tr, thw


def _choose_fold_width(thw):
    """Smallest multiple-of-128 divisor of thw keeping the per-tile fold
    unroll bounded (thw // w <= 256)."""
    for w in (128, 256, 512, 1024, 2048, 4096):
        if thw % w == 0 and thw // w <= 256:
            return w
    for w in (4096, 2048, 1024, 512, 256, 128):
        if thw % w == 0:
            return w
    return 128


def _device_config():
    """(target_block_bytes, vmem_cap_bytes, num_cores) per TPU generation.
    v7x: 64 MiB VMEM / 2 TCs -> smaller blocks + row-axis split.
    v5e/v6e: 128 MiB VMEM / 1 TC -> bigger streaming blocks."""
    kind = ""
    try:
        kind = jax.devices()[0].device_kind.lower()
    except Exception:
        pass
    vmem_phys = None
    try:
        info = pltpu.get_tpu_info()
        vmem_phys = getattr(info, "vmem_capacity_bytes", None)
    except Exception:
        pass
    small_vmem = ("v7" in kind) or (
        vmem_phys is not None and vmem_phys <= (64 << 20))
    num_cores = 2 if "v7" in kind else 1
    if small_vmem:
        return 4 << 20, 52 << 20, num_cores
    return 8 << 20, 100 << 20, num_cores


# ---------------------------------------------------------------------------
# Wrapper
# ---------------------------------------------------------------------------
def weight_balance_bce_with_logits(pred, gt, *, assume_binary_gt=False,
                                   target_block_bytes=None,
                                   min_row_steps=None):
    """pred (logits), gt: (b, c, h, w). Returns scalar float32 loss matching
    F.binary_cross_entropy_with_logits(pred, gt, weight=get_weights(gt),
                                       reduction='mean')."""
    b, c, h, w = gt.shape
    total = h * w
    clamp_max = float(int(h * w * 0.2))
    n_elems = b * c * h * w

    rows, hw = b * c, h * w
    pred2 = pred.reshape(rows, hw)
    gt2 = gt.reshape(rows, hw)

    # Pad hw to a multiple of 128. Padded gt pixels use sentinel 2.0 ->
    # neither pos nor neg -> weight 0 -> contribute nothing.
    hw_p = ((hw + 127) // 128) * 128
    if hw_p != hw:
        padn = hw_p - hw
        pred2 = jnp.pad(pred2, ((0, 0), (0, padn)))
        gt2 = jnp.pad(gt2, ((0, 0), (0, padn)), constant_values=2)
        assume_binary_gt = False   # sentinel breaks the arithmetic fast path

    tgt_default, vmem_cap, num_cores = _device_config()
    if target_block_bytes is None:
        target_block_bytes = tgt_default
    if min_row_steps is None:
        min_row_steps = num_cores   # >=2 row-grid steps on v7x (2 TCs)

    p_isz = jnp.dtype(pred2.dtype).itemsize
    g_isz = jnp.dtype(gt2.dtype).itemsize
    tr, thw = _choose_tiles(rows, hw_p, max(p_isz, g_isz),
                            target_block_bytes, min_row_steps)
    fold_w = _choose_fold_width(thw)
    grid = (rows // tr, hw_p // thw)

    # VMEM budget from actual need: double-buffered inputs + accumulator
    # outputs + elementwise temporaries (~5 live f32 tiles) + margin.
    in_buf = 2 * tr * thw * (p_isz + g_isz)
    out_buf = 2 * 3 * tr * fold_w * 4
    temps = 5 * tr * thw * 4
    vmem_limit = int(min(in_buf + out_buf + temps + (4 << 20), vmem_cap))

    kernel = functools.partial(_wbce_kernel, fold_w=fold_w,
                               assume_binary_gt=assume_binary_gt)

    acc_spec = pl.BlockSpec((tr, fold_w), lambda i, j: (i, 0))
    acc_shape = jax.ShapeDtypeStruct((rows, fold_w), jnp.float32)

    n_stream = rows * hw_p
    cost = pl.CostEstimate(
        flops=15 * n_stream,
        transcendentals=2 * n_stream,
        bytes_accessed=n_stream * (p_isz + g_isz) + 3 * rows * fold_w * 4,
    )

    neg_p, pbce_p, nbce_p = pl.pallas_call(
        kernel,
        out_shape=(acc_shape, acc_shape, acc_shape),
        grid_spec=pltpu.PrefetchScalarGridSpec(
            num_scalar_prefetch=0,
            grid=grid,
            in_specs=[
                pl.BlockSpec((tr, thw), lambda i, j: (i, j)),
                pl.BlockSpec((tr, thw), lambda i, j: (i, j)),
            ],
            out_specs=(acc_spec, acc_spec, acc_spec),
        ),
        compiler_params=pltpu.CompilerParams(
            dimension_semantics=("parallel", "arbitrary"),
            vmem_limit_bytes=vmem_limit,
        ),
        cost_estimate=cost,
    )(pred2, gt2)

    # Tiny finalize on (rows,)-sized data: lane reduce, clamp, alphas, mean.
    sum_neg = jnp.sum(neg_p, axis=-1)
    sum_pos_bce = jnp.sum(pbce_p, axis=-1)
    sum_neg_bce = jnp.sum(nbce_p, axis=-1)

    num_neg = jnp.minimum(sum_neg, jnp.float32(clamp_max))
    num_pos = jnp.float32(total) - num_neg
    alpha_pos = 0.5 * jnp.float32(total) / num_pos
    # alpha_neg is inf (-> NaN loss) for rows with zero negative pixels,
    # matching the PyTorch reference behavior.
    alpha_neg = 0.5 * jnp.float32(total) / num_neg

    weighted = alpha_pos * sum_pos_bce + alpha_neg * sum_neg_bce
    inv_n = 1.0 / float(n_elems)   # reciprocal in double; one rounding to f32
    return jnp.sum(weighted) * jnp.float32(inv_n)


# ---------------------------------------------------------------------------
# Pure-JAX reference (mirrors the PyTorch module)
# ---------------------------------------------------------------------------
def _reference(pred, gt):
    b, c, h, w = gt.shape
    total = h * w
    pos = (gt == 1.0).astype(jnp.float32)
    neg = (gt == 0.0).astype(jnp.float32)
    num_neg = jnp.minimum(jnp.sum(neg, axis=(-1, -2)), float(int(h * w * 0.2)))
    num_pos = total - num_neg
    alpha_pos = 0.5 * total / num_pos
    alpha_neg = 0.5 * total / num_neg
    weights = (pos * alpha_pos[:, :, None, None]
               + neg * alpha_neg[:, :, None, None])
    x = pred
    bce = jnp.maximum(x, 0.0) - x * gt + jnp.log1p(jnp.exp(-jnp.abs(x)))
    return jnp.mean(weights * bce)


if __name__ == "__main__":
    key = jax.random.PRNGKey(0)
    ks = jax.random.split(key, 6)

    # Case 1: canonical small shape, default (device-tuned) tiling.
    b, c, h, w = 2, 4, 16, 16
    pred = jax.random.normal(ks[0], (b, c, h, w), dtype=jnp.float32)   # logits
    gt = jax.random.bernoulli(ks[1], 0.3, (b, c, h, w)).astype(jnp.float32)
    loss = jax.block_until_ready(weight_balance_bce_with_logits(pred, gt))
    ref = jax.block_until_ready(_reference(pred, gt))
    assert jnp.allclose(loss, ref, rtol=1e-5, atol=1e-5), (loss, ref)

    # Case 2: force multi-tile grid on BOTH axes (cross-tile accumulation +
    # per-row-tile writeback) and exercise the binary-gt fast path.
    b, c, h, w = 4, 4, 16, 16
    pred = jax.random.normal(ks[2], (b, c, h, w), dtype=jnp.float32)
    gt = jax.random.bernoulli(ks[3], 0.3, (b, c, h, w)).astype(jnp.float32)
    loss = jax.block_until_ready(weight_balance_bce_with_logits(
        pred, gt, target_block_bytes=8 * 128 * 4, min_row_steps=2,
        assume_binary_gt=True))
    ref = jax.block_until_ready(_reference(pred, gt))
    assert jnp.allclose(loss, ref, rtol=1e-5, atol=1e-5), (loss, ref)

    # Case 3: hw not a multiple of 128 -> sentinel-padded path.
    b, c, h, w = 2, 3, 10, 10
    pred = jax.random.normal(ks[4], (b, c, h, w), dtype=jnp.float32)
    gt = jax.random.bernoulli(ks[5], 0.3, (b, c, h, w)).astype(jnp.float32)
    loss = jax.block_until_ready(weight_balance_bce_with_logits(pred, gt))
    ref = jax.block_until_ready(_reference(pred, gt))
    assert jnp.allclose(loss, ref, rtol=1e-5, atol=1e-5), (loss, ref)

    print("KERNEL_OK")
</pallas_src>

<mosaic_0001>
module attributes {stable_mosaic.version = 11 : i64} {
  func.func @_wbce_kernel(%arg0: i32, %arg1: i32, %arg2: memref<8x256xf32, #tpu.memory_space<vmem>>, %arg3: memref<8x256xf32, #tpu.memory_space<vmem>>, %arg4: memref<8x128xf32, #tpu.memory_space<vmem>>, %arg5: memref<8x128xf32, #tpu.memory_space<vmem>>, %arg6: memref<8x128xf32, #tpu.memory_space<vmem>>) attributes {dimension_semantics = [#tpu.dimension_semantics<parallel>, #tpu.dimension_semantics<arbitrary>], iteration_bounds = array<i64: 1, 1>, scalar_prefetch = 0 : i64, scratch_operands = 0 : i64, tpu.core_type = #tpu.core_type<tc>, window_params = [{transform_indices = @transform_0, window_bounds = array<i64: 8, 256>}, {transform_indices = @transform_1, window_bounds = array<i64: 8, 256>}, {transform_indices = @transform_2, window_bounds = array<i64: 8, 128>}, {transform_indices = @transform_3, window_bounds = array<i64: 8, 128>}, {transform_indices = @transform_4, window_bounds = array<i64: 8, 128>}]} {
    %c0_i32 = arith.constant 0 : i32
    %0 = arith.cmpi eq, %arg1, %c0_i32 : i32
    %1 = arith.extui %0 : i1 to i32
    %c0_i32_0 = arith.constant 0 : i32
    %2 = arith.cmpi ne, %1, %c0_i32_0 : i32
    scf.if %2 {
      %cst_19 = arith.constant 0.000000e+00 : f32
      %43 = vector.broadcast %cst_19 : f32 to vector<8x128xf32>
      %c0_20 = arith.constant 0 : index
      %c0_21 = arith.constant 0 : index
      %44 = vector.load %arg4[%c0_20, %c0_21] : memref<8x128xf32, #tpu.memory_space<vmem>>, vector<8x128xf32>
      tpu.vector_store %arg4[%c0_20, %c0_21], %43 {strides = array<i32>} : memref<8x128xf32, #tpu.memory_space<vmem>>, vector<8x128xf32>,
      %cst_22 = arith.constant 0.000000e+00 : f32
      %45 = vector.broadcast %cst_22 : f32 to vector<8x128xf32>
      %c0_23 = arith.constant 0 : index
      %c0_24 = arith.constant 0 : index
      %46 = vector.load %arg5[%c0_23, %c0_24] : memref<8x128xf32, #tpu.memory_space<vmem>>, vector<8x128xf32>
      tpu.vector_store %arg5[%c0_23, %c0_24], %45 {strides = array<i32>} : memref<8x128xf32, #tpu.memory_space<vmem>>, vector<8x128xf32>,
      %cst_25 = arith.constant 0.000000e+00 : f32
      %47 = vector.broadcast %cst_25 : f32 to vector<8x128xf32>
      %c0_26 = arith.constant 0 : index
      %c0_27 = arith.constant 0 : index
      %48 = vector.load %arg6[%c0_26, %c0_27] : memref<8x128xf32, #tpu.memory_space<vmem>>, vector<8x128xf32>
      tpu.vector_store %arg6[%c0_26, %c0_27], %47 {strides = array<i32>} : memref<8x128xf32, #tpu.memory_space<vmem>>, vector<8x128xf32>,
    } else {
    }
    %c0 = arith.constant 0 : index
    %c0_1 = arith.constant 0 : index
    %3 = vector.load %arg2[%c0, %c0_1] : memref<8x256xf32, #tpu.memory_space<vmem>>, vector<8x256xf32>
    %c0_2 = arith.constant 0 : index
    %c0_3 = arith.constant 0 : index
    %4 = vector.load %arg3[%c0_2, %c0_3] : memref<8x256xf32, #tpu.memory_space<vmem>>, vector<8x256xf32>
    %cst = arith.constant 0.000000e+00 : f32
    %5 = vector.broadcast %cst : f32 to vector<8x256xf32>
    %6 = arith.maximumf %3, %5 : vector<8x256xf32>
    %7 = arith.mulf %3, %4 : vector<8x256xf32>
    %8 = arith.subf %6, %7 : vector<8x256xf32>
    %9 = math.absf %3 : vector<8x256xf32>
    %cst_4 = arith.constant 0.000000e+00 : f32
    %10 = vector.broadcast %cst_4 : f32 to vector<8x256xf32>
    %11 = arith.subf %10, %9 : vector<8x256xf32>
    %12 = math.exp %11 : vector<8x256xf32>
    %13 = math.log1p %12 : vector<8x256xf32>
    %14 = arith.addf %8, %13 : vector<8x256xf32>
    %cst_5 = arith.constant 1.000000e+00 : f32
    %15 = vector.broadcast %cst_5 : f32 to vector<8x256xf32>
    %16 = arith.cmpf oeq, %4, %15 : vector<8x256xf32>
    %17 = arith.extui %16 : vector<8x256xi1> to vector<8x256xi32>
    %18 = arith.sitofp %17 : vector<8x256xi32> to vector<8x256xf32>
    %cst_6 = arith.constant 0.000000e+00 : f32
    %19 = vector.broadcast %cst_6 : f32 to vector<8x256xf32>
    %20 = arith.cmpf oeq, %4, %19 : vector<8x256xf32>
    %21 = arith.extui %20 : vector<8x256xi1> to vector<8x256xi32>
    %22 = arith.sitofp %21 : vector<8x256xi32> to vector<8x256xf32>
    %c0_7 = arith.constant 0 : index
    %c0_8 = arith.constant 0 : index
    %23 = vector.load %arg4[%c0_7, %c0_8] : memref<8x128xf32, #tpu.memory_space<vmem>>, vector<8x128xf32>
    %24 = vector.extract_strided_slice %22 {offsets = [0, 0], sizes = [8, 128], strides = [1, 1]} : vector<8x256xf32> to vector<8x128xf32>
    %25 = vector.extract_strided_slice %22 {offsets = [0, 128], sizes = [8, 128], strides = [1, 1]} : vector<8x256xf32> to vector<8x128xf32>
    %26 = arith.addf %24, %25 : vector<8x128xf32>
    %27 = arith.addf %23, %26 : vector<8x128xf32>
    %c0_9 = arith.constant 0 : index
    %c0_10 = arith.constant 0 : index
    %28 = vector.load %arg4[%c0_9, %c0_10] : memref<8x128xf32, #tpu.memory_space<vmem>>, vector<8x128xf32>
    tpu.vector_store %arg4[%c0_9, %c0_10], %27 {strides = array<i32>} : memref<8x128xf32, #tpu.memory_space<vmem>>, vector<8x128xf32>,
    %c0_11 = arith.constant 0 : index
    %c0_12 = arith.constant 0 : index
    %29 = vector.load %arg5[%c0_11, %c0_12] : memref<8x128xf32, #tpu.memory_space<vmem>>, vector<8x128xf32>
    %30 = arith.mulf %18, %14 : vector<8x256xf32>
    %31 = vector.extract_strided_slice %30 {offsets = [0, 0], sizes = [8, 128], strides = [1, 1]} : vector<8x256xf32> to vector<8x128xf32>
    %32 = vector.extract_strided_slice %30 {offsets = [0, 128], sizes = [8, 128], strides = [1, 1]} : vector<8x256xf32> to vector<8x128xf32>
    %33 = arith.addf %31, %32 : vector<8x128xf32>
    %34 = arith.addf %29, %33 : vector<8x128xf32>
    %c0_13 = arith.constant 0 : index
    %c0_14 = arith.constant 0 : index
    %35 = vector.load %arg5[%c0_13, %c0_14] : memref<8x128xf32, #tpu.memory_space<vmem>>, vector<8x128xf32>
    tpu.vector_store %arg5[%c0_13, %c0_14], %34 {strides = array<i32>} : memref<8x128xf32, #tpu.memory_space<vmem>>, vector<8x128xf32>,
    %c0_15 = arith.constant 0 : index
    %c0_16 = arith.constant 0 : index
    %36 = vector.load %arg6[%c0_15, %c0_16] : memref<8x128xf32, #tpu.memory_space<vmem>>, vector<8x128xf32>
    %37 = arith.mulf %22, %14 : vector<8x256xf32>
    %38 = vector.extract_strided_slice %37 {offsets = [0, 0], sizes = [8, 128], strides = [1, 1]} : vector<8x256xf32> to vector<8x128xf32>
    %39 = vector.extract_strided_slice %37 {offsets = [0, 128], sizes = [8, 128], strides = [1, 1]} : vector<8x256xf32> to vector<8x128xf32>
    %40 = arith.addf %38, %39 : vector<8x128xf32>
    %41 = arith.addf %36, %40 : vector<8x128xf32>
    %c0_17 = arith.constant 0 : index
    %c0_18 = arith.constant 0 : index
    %42 = vector.load %arg6[%c0_17, %c0_18] : memref<8x128xf32, #tpu.memory_space<vmem>>, vector<8x128xf32>
    tpu.vector_store %arg6[%c0_17, %c0_18], %41 {strides = array<i32>} : memref<8x128xf32, #tpu.memory_space<vmem>>, vector<8x128xf32>,
    return
  }
  func.func @transform_0(%arg0: i32, %arg1: i32) -> (i32, i32) {
    %c0_i32 = arith.constant 0 : i32
    return %arg0, %arg1 : i32, i32
  }
  func.func @transform_1(%arg0: i32, %arg1: i32) -> (i32, i32) {
    %c0_i32 = arith.constant 0 : i32
    return %arg0, %arg1 : i32, i32
  }
  func.func @transform_2(%arg0: i32, %arg1: i32) -> (i32, i32) {
    %c0_i32 = arith.constant 0 : i32
    %c0_i32_0 = arith.constant 0 : i32
    return %arg0, %c0_i32 : i32, i32
  }
  func.func @transform_3(%arg0: i32, %arg1: i32) -> (i32, i32) {
    %c0_i32 = arith.constant 0 : i32
    %c0_i32_0 = arith.constant 0 : i32
    return %arg0, %c0_i32 : i32, i32
  }
  func.func @transform_4(%arg0: i32, %arg1: i32) -> (i32, i32) {
    %c0_i32 = arith.constant 0 : i32
    %c0_i32_0 = arith.constant 0 : i32
    return %arg0, %c0_i32 : i32, i32
  }
}

</mosaic_0001>

<bundles_post_ra>
// kernel: tpu_custom_call.1
= control target key start
LH: loop header
LB: loop body
LE: loop exit
PB: predicated region body
PF: predicated region fallthrough
CT: control target
= control target key end

     0   :  { %10 = vsyncpa [#allocation3], 0  ;;  %s328_s0 = inlined_call_operand.hbm [shape: f32[8,256], index: 0, kind: input, shape index: {}]   ;;  %s329_s1 = inlined_call_operand.hbm [shape: f32[8,256], index: 1, kind: input, shape index: {}]   ;;  %s330_s2 = inlined_call_operand.hbm [shape: f32[8,128], index: 2, kind: output, shape index: {0}]   ;;  %s331_s3 = inlined_call_operand.hbm [shape: f32[8,128], index: 3, kind: output, shape index: {1}]   ;;  %s332_s4 = inlined_call_operand.hbm [shape: f32[8,128], index: 4, kind: output, shape index: {2}]  }
   0x1   :  { %11 = vsyncpa [#allocation6], 0 }
   0x2   :  { %12 = vsyncpa [#allocation4], 0 }
   0x3   :  { %13 = vsyncpa [#allocation9], 0  ;;  %s282_s15 = smov [#allocation2]   ;;  %s283_s17 = smov [#allocation5]  }
   0x4   :  { %s20_s16 = sshll.u32 %s282_s15, 4  ;;  %s30_s18 = sshll.u32 %s283_s17, 4  ;;  %s21_s16 = int_to_ptr.vmem [resolvable:$true] %s20_s16  ;;  %s31_s18 = int_to_ptr.vmem [resolvable:$true] %s30_s18 }
   0x5   :  { %s182_s19 = scalar_lea.vmem %s21_s16, 256  ;;  %p187_p1 = scmp.lt.s32.totalorder %s21_s16, %s21_s16 }
   0x6   :  { %p183_p0 = scmp.ne.s32.totalorder %s21_s16, %s182_s19  ;;  %p188_p2 = scmp.lt.s32.totalorder %s182_s19, %s182_s19 }
   0x8   :  { %p189_p3 = por %p188_p2, %p187_p1 }
   0xa   :  { %p190_p4 = pnand %p189_p3, %p183_p0 }
   0xc   :  { %193 = shalt.err (!%p190_p4)
}
   0xd   :  { %23 = dma.hbm_to_vmem [thread:$0]  %s328_s0, 256, %s21_s16, [#allocation3]  }
   0xe   :  { %s202_s22 = scalar_lea.vmem %s31_s18, 256  ;;  %p207_p6 = scmp.lt.s32.totalorder %s31_s18, %s31_s18 }
   0xf   :  { %p203_p5 = scmp.ne.s32.totalorder %s31_s18, %s202_s22  ;;  %p208_p7 = scmp.lt.s32.totalorder %s202_s22, %s202_s22 }
  0x11   :  { %p209_p8 = por %p208_p7, %p207_p6 }
  0x13   :  { %p210_p9 = pnand %p209_p8, %p203_p5 }
  0x15   :  { %213 = shalt.err (!%p210_p9)
}
  0x16   :  { %33 = dma.hbm_to_vmem [thread:$0]  %s329_s1, 256, %s31_s18, [#allocation6]  }
  0x17   :  { %274 = dma.done.wait [#allocation3], 256  }
  0x18   :  { %275 = vsyncadd [#allocation3], 4294967040 }
  0x19   :  { %276 = dma.done.wait [#allocation6], 256  }
  0x1a   :  { %277 = vsyncadd [#allocation6], 4294967040  ;;  %v47_v0 = vld [vmem:[#allocation2] sm:$0xff]  ;;  %v48_v1 = vld [vmem:[#allocation2 + $0x8] sm:$0xff]  ;;  %v284_v9 = vmov 0.0   ;;  %s285_s0 = smov [#allocation7]  }
  0x1b   :  { %v57_v2 = vand.u32 2147483647, %v47_v0  ;;  %v58_v3 = vand.u32 2147483647, %v48_v1  ;;  %v49_v4 = vld [vmem:[#allocation5] sm:$0xff]  ;;  %v50_v5 = vld [vmem:[#allocation5 + $0x8] sm:$0xff] }
  0x1c   :  { %vm91_vm0 = vcmp.eq.f32.partialorder %v49_v4, 0.0  ;;  %vm92_vm1 = vcmp.eq.f32.partialorder %v50_v5, 0.0  ;;  %s119_s1 = sshll.u32 %s285_s0, 4  ;;  %s120_s1 = int_to_ptr.vmem [resolvable:$true] %s119_s1 }
  0x1d   :  { %v59_v6 = vsub.f32 0.0, %v57_v2  ;;  %v60_v7 = vsub.f32 0.0, %v58_v3  ;;  %v158_v10 = vsel %vm91_vm0, 1.0, %v284_v9  ;;  %v159_v11 = vsel %vm92_vm1, 1.0, %v284_v9  ;;  %s214_s25 = scalar_lea.vmem %s120_s1, 128  ;;  %p219_p11 = scmp.lt.s32.totalorder %s120_s1, %s120_s1 }
  0x1e   :  { %v98_v13 = vadd.f32 %v159_v11, %v158_v10  ;;  %p215_p10 = scmp.ne.s32.totalorder %s120_s1, %s214_s25  ;;  %p220_p12 = scmp.lt.s32.totalorder %s214_s25, %s214_s25 }
  0x1f   :  { %v61_v8 = vmul.f32 1.442695, %v59_v6  ;;  %v63_v12 = vmul.f32 1.442695, %v60_v7 }
  0x20   :  { %100 = vst [vmem:[#allocation7] sm:$0xff] %v98_v13  ;;  %p221_p13 = por %p220_p12, %p219_p11 }
  0x21   :  { %166 = vpow2.f32 %v61_v8 }
  0x22   :  { %168 = vpow2.f32 %v63_v12  ;;  %p222_p0 = pnand %p221_p13, %p215_p10 }
  0x24   :  { %225 = shalt.err (!%p222_p0)
}
  0x25   :  { %122 = dma.vmem_to_hbm [thread:$0]  %s120_s1, 128, %s330_s2, [#allocation4]   ;;  %v51_v21 = vmax.f32 %v47_v0, 0.0  ;;  %v53_v22 = vmul.f32 %v49_v4, %v47_v0  ;;  %v52_v25 = vmax.f32 %v48_v1, 0.0  ;;  %v54_v26 = vmul.f32 %v50_v5, %v48_v1 }
  0x26   :  { %vm85_vm3 = vcmp.eq.f32.partialorder %v49_v4, 1.0  ;;  %vm86_vm5 = vcmp.eq.f32.partialorder %v50_v5, 1.0  ;;  %s286_s2 = smov [#allocation8]   ;;  %s287_s29 = smov [#allocation10]  }
  0x27   :  { %v55_v30 = vsub.f32 %v51_v21, %v53_v22  ;;  %v56_v33 = vsub.f32 %v52_v25, %v54_v26  ;;  %v156_v37 = vsel %vm85_vm3, 1.0, %v284_v9  ;;  %v157_v40 = vsel %vm86_vm5, 1.0, %v284_v9  ;;  %s129_s28 = sshll.u32 %s286_s2, 4  ;;  %s139_s30 = sshll.u32 %s287_s29, 4  ;;  %s130_s28 = int_to_ptr.vmem [resolvable:$true] %s129_s28  ;;  %s140_s30 = int_to_ptr.vmem [resolvable:$true] %s139_s30 }
  0x28   :  { %s234_s5 = scalar_lea.vmem %s130_s28, 128  ;;  %p239_p2 = scmp.lt.s32.totalorder %s130_s28, %s130_s28 }
  0x29   :  { %p235_p1 = scmp.ne.s32.totalorder %s130_s28, %s234_s5  ;;  %p240_p3 = scmp.lt.s32.totalorder %s234_s5, %s234_s5 }
  0x2b   :  { %p241_p4 = por %p240_p3, %p239_p2 }
  0x2d   :  { %p242_p5 = pnand %p241_p4, %p235_p1 }
  0x2e   :  { %v167_v14 = vpop.eup %166 }
  0x2f   :  { %v169_v15 = vpop.eup %168  ;;  %v65_v16 = vadd.f32 1.0, %v167_v14  ;;  %v68_v18 = vmul.f32 -0.5, %v167_v14  ;;  %v71_v23 = vand.u32 2147483647, %v167_v14 }
  0x30   :  { %v74_v17 = vadd.f32 1.0, %v169_v15  ;;  %v77_v19 = vmul.f32 -0.5, %v169_v15  ;;  %v80_v27 = vand.u32 2147483647, %v169_v15 }
  0x31   :  { %170 = vlog2.f32 %v65_v16  ;;  %v69_v20 = vadd.f32 1.0, %v68_v18  ;;  %vm72_vm2 = vcmp.lt.f32.partialorder %v71_v23, 0.0004427343 }
  0x32   :  { %172 = vlog2.f32 %v74_v17  ;;  %v78_v24 = vadd.f32 1.0, %v77_v19  ;;  %vm81_vm4 = vcmp.lt.f32.partialorder %v80_v27, 0.0004427343 }
  0x33   :  { %v70_v28 = vmul.f32 %v167_v14, %v69_v20 }
  0x34   :  { %v79_v31 = vmul.f32 %v169_v15, %v78_v24 }
  0x3e   :  { %v171_v29 = vpop.eup %170 }
  0x3f   :  { %v173_v32 = vpop.eup %172  ;;  %v67_v34 = vmul.f32 0.6931472, %v171_v29 }
  0x40   :  { %v76_v35 = vmul.f32 0.6931472, %v173_v32 }
  0x41   :  { %v73_v36 = vsel %vm72_vm2, %v70_v28, %v67_v34 }
  0x42   :  { %v82_v38 = vsel %vm81_vm4, %v79_v31, %v76_v35  ;;  %v83_v39 = vadd.f32 %v73_v36, %v55_v30 }
  0x43   :  { %v84_v41 = vadd.f32 %v82_v38, %v56_v33 }
  0x44   :  { %v102_v42 = vmul.f32 %v156_v37, %v83_v39  ;;  %v108_v43 = vmul.f32 %v158_v10, %v83_v39 }
  0x45   :  { %v103_v44 = vmul.f32 %v157_v40, %v84_v41  ;;  %v109_v45 = vmul.f32 %v159_v11, %v84_v41 }
  0x47   :  { %v104_v46 = vadd.f32 %v103_v44, %v102_v42  ;;  %v110_v47 = vadd.f32 %v109_v45, %v108_v43 }
  0x49   :  { %106 = vst [vmem:[#allocation8] sm:$0xff] %v104_v46  ;;  %112 = vst [vmem:[#allocation10] sm:$0xff] %v110_v47 }
  0x4a   :  { %245 = shalt.err (!%p242_p5)
}
  0x4b   :  { %132 = dma.vmem_to_hbm [thread:$0]  %s130_s28, 128, %s331_s3, [#allocation9]  }
  0x4c   :  { %s254_s8 = scalar_lea.vmem %s140_s30, 128  ;;  %p259_p7 = scmp.lt.s32.totalorder %s140_s30, %s140_s30 }
  0x4d   :  { %p255_p6 = scmp.ne.s32.totalorder %s140_s30, %s254_s8  ;;  %p260_p8 = scmp.lt.s32.totalorder %s254_s8, %s254_s8 }
  0x4f   :  { %p261_p9 = por %p260_p8, %p259_p7 }
  0x51   :  { %p262_p10 = pnand %p261_p9, %p255_p6 }
  0x53   :  { %265 = shalt.err (!%p262_p10)
}
  0x54   :  { %142 = dma.vmem_to_hbm [thread:$0]  %s140_s30, 128, %s332_s4, [#allocation9]  }
  0x55   :  { %278 = dma.done.wait [#allocation4], 128  }
  0x56   :  { %279 = vsyncadd [#allocation4], 4294967168 }
  0x57   :  { %280 = dma.done.wait [#allocation9], 256  }
  0x58   :  { %281 = vsyncadd [#allocation9], 4294967040 }
  0x59   :  { %152 = vsyncpa [#allocation3], 1 }
  0x5a   :  { %153 = vsyncpa [#allocation6], 1 }
  0x5b   :  { %154 = vsyncpa [#allocation4], 1 }
  0x5c   :  { %155 = vsyncpa [#allocation9], 1 }

</bundles_post_ra>
